<compile_context>
chip_gen: v6e
topology: v6e:2x2x1
jax: 0.10.0
libtpu: 0.0.40
codegen_flags: <defaults>
</compile_context>

<pallas_src>
import functools

import jax
import jax.numpy as jnp
from jax.experimental import pallas as pl
from jax.experimental.pallas import tpu as pltpu


_WORKSET_FRACTION = 0.75               # headroom for weights / compiler scratch
TARGET_STEP_BYTES = 8 * 1024 * 1024    # aim for ~8 MiB of x moved per grid step


@functools.lru_cache(maxsize=None)
def _vmem_budget_bytes():
    """Chip-dependent VMEM budget (~0.75 * per-core VMEM capacity)."""
    cap = None
    try:
        info = pltpu.get_tpu_info()
        cap = getattr(info, "vmem_capacity_bytes", None)
    except Exception:
        cap = None
    if not cap:
        cap = 64 * 1024 * 1024          # conservative fallback (v7x per-TC)
    return int(cap) * 3 // 4


def _sublane_multiple(dtype):
    """Packed sublane multiple: 8 for f32, 16 for bf16, 32 for int8/fp8."""
    return max(8, 32 // jnp.dtype(dtype).itemsize)


# ----------------------------------------------------------------------------
# Fused fast path: one grid step = BB batch elements, full (C, HW) resident.
# ----------------------------------------------------------------------------
def _ca_fused_kernel(x_ref, w1t_ref, b1_ref, w2_ref, b2_ref, o_ref, *, inv_hw):
    # x_ref: (BB, C, HW)  w1t: (C, Cmid)  b1: (1, Cmid)  w2: (C, Cmid)  b2: (C, 1)
    x = x_ref[...]
    # Global average pool over spatial lanes; accumulate in f32 without
    # materializing a full-block f32 upcast.
    y = jnp.sum(x, axis=-1, dtype=jnp.float32, keepdims=True) * inv_hw  # (BB, C, 1)
    # 1x1 conv #1 + ReLU on the VPU/XLU: h[b, m] = sum_c w1t[c, m] * y[b, c]
    h = jnp.sum(w1t_ref[...][None, :, :] * y, axis=1, keepdims=True)     # (BB, 1, Cmid)
    h = jnp.maximum(h + b1_ref[...][None, :, :], 0.0)
    # 1x1 conv #2 + sigmoid: s[b, c] = sum_m w2[c, m] * h[b, m]
    s = jnp.sum(w2_ref[...][None, :, :] * h, axis=-1, keepdims=True)     # (BB, C, 1)
    s = jax.nn.sigmoid(s + b2_ref[...][None, :, :])
    # Channel-wise rescale in the streaming dtype (exact for f32; for bf16 the
    # scale rounding costs ~1 ulp vs the f32 reference - acceptable).
    o_ref[...] = (x * s.astype(x.dtype)).astype(o_ref.dtype)


def _pick_bb(B, bb_cap):
    """Pick per-step batch so the grid has an even number of steps, >=4 when
    B allows (v7x shards the 'parallel' batch axis across 2 TensorCores)."""
    bb = max(1, bb_cap)
    if B >= 4:
        bb = min(bb, max(1, B // 4))
        while bb > 1 and pl.cdiv(B, bb) % 2 != 0:
            bb -= 1
    elif B >= 2:
        bb = min(bb, max(1, B // 2))
    return max(1, min(bb, B))


def _ca_fused(x_flat, w1t, b1r, w2, b2c, *, donate_x):
    B, C, HW = x_flat.shape
    Cmid = w1t.shape[1]
    item = x_flat.dtype.itemsize
    budget = int(_vmem_budget_bytes() * _WORKSET_FRACTION)

    bytes_per_b = C * HW * item
    # Per-step working set ~ 4 * BB * bytes_per_b (x in + out, double-buffered)
    # plus the small f32 MLP temporaries ((C, Cmid) broadcast product, vectors).
    f32_temp_per_b = 4 * C * (Cmid + 2)
    max_bb_vmem = max(1, budget // (4 * bytes_per_b + f32_temp_per_b))
    bb_cap = min(B, max_bb_vmem, max(1, TARGET_STEP_BYTES // bytes_per_b))
    bb = _pick_bb(B, bb_cap)
    nb = pl.cdiv(B, bb)

    kernel = functools.partial(_ca_fused_kernel, inv_hw=1.0 / HW)
    return pl.pallas_call(
        kernel,
        out_shape=jax.ShapeDtypeStruct((B, C, HW), x_flat.dtype),
        grid_spec=pltpu.PrefetchScalarGridSpec(
            num_scalar_prefetch=0,
            grid=(nb,),
            in_specs=[
                pl.BlockSpec((bb, C, HW), lambda ib: (ib, 0, 0)),   # x
                pl.BlockSpec((C, Cmid), lambda ib: (0, 0)),         # w1^T
                pl.BlockSpec((1, Cmid), lambda ib: (0, 0)),         # b1
                pl.BlockSpec((C, Cmid), lambda ib: (0, 0)),         # w2
                pl.BlockSpec((C, 1), lambda ib: (0, 0)),            # b2
            ],
            out_specs=pl.BlockSpec((bb, C, HW), lambda ib: (ib, 0, 0)),
        ),
        compiler_params=pltpu.CompilerParams(
            dimension_semantics=("parallel",),
            vmem_limit_bytes=_vmem_budget_bytes()),
        input_output_aliases=({0: 0} if donate_x else {}),
    )(x_flat, w1t, b1r, w2, b2c)


# ----------------------------------------------------------------------------
# Two-pass path for large C*HW.
# Pass 1: GAP + MLP -> per-(b,c) scales, HW tiled with a resident accumulator.
# ----------------------------------------------------------------------------
def _ca_scales_kernel(x_ref, w1t_ref, b1_ref, w2_ref, b2_ref, s_ref, acc_ref,
                      *, hw, thw):
    k = pl.program_id(1)
    last = pl.num_programs(1) - 1

    @pl.when(k == 0)
    def _():
        acc_ref[...] = jnp.zeros_like(acc_ref)

    x = x_ref[...]                                            # (C, THW), stream dtype
    if hw % thw != 0:
        # Only the last (partial) tile pays for the lane mask.
        @pl.when(k == last)
        def _():
            lane = jax.lax.broadcasted_iota(jnp.int32, x.shape, 1)
            xm = jnp.where(k * thw + lane < hw, x, jnp.zeros_like(x))
            acc_ref[...] += jnp.sum(xm, axis=-1, dtype=jnp.float32, keepdims=True)

        @pl.when(k != last)
        def _():
            acc_ref[...] += jnp.sum(x, axis=-1, dtype=jnp.float32, keepdims=True)
    else:
        acc_ref[...] += jnp.sum(x, axis=-1, dtype=jnp.float32, keepdims=True)

    @pl.when(k == last)
    def _():
        y = acc_ref[...] * (1.0 / hw)                        # (C, 1) mean
        # VPU MLP: h[m] = sum_c w1t[c, m] * y[c]
        h = jnp.sum(w1t_ref[...] * y, axis=0, keepdims=True) + b1_ref[...]  # (1, Cmid)
        h = jnp.maximum(h, 0.0)
        s = jnp.sum(w2_ref[...] * h, axis=-1, keepdims=True) + b2_ref[...]  # (C, 1)
        s_ref[...] = jax.nn.sigmoid(s)


def _ca_scales(x_flat, w1t, b1r, w2, b2c):
    B, C, HW = x_flat.shape
    Cmid = w1t.shape[1]
    item = x_flat.dtype.itemsize
    budget = int(_vmem_budget_bytes() * _WORKSET_FRACTION)

    if 2 * C * HW * item <= budget:
        thw = HW                                             # full extent (allowed)
    else:
        thw = max(128, (budget // (2 * C * item)) // 128 * 128)  # multiple of 128
        thw = min(thw, HW)                                   # degenerate-shape guard
    n_hw = pl.cdiv(HW, thw)

    kernel = functools.partial(_ca_scales_kernel, hw=HW, thw=thw)
    return pl.pallas_call(
        kernel,
        out_shape=jax.ShapeDtypeStruct((B, C, 1), jnp.float32),
        grid_spec=pltpu.PrefetchScalarGridSpec(
            num_scalar_prefetch=0,
            grid=(B, n_hw),
            in_specs=[
                pl.BlockSpec((None, C, thw), lambda b, k: (b, 0, k)),  # x
                pl.BlockSpec((C, Cmid), lambda b, k: (0, 0)),          # w1^T
                pl.BlockSpec((1, Cmid), lambda b, k: (0, 0)),          # b1
                pl.BlockSpec((C, Cmid), lambda b, k: (0, 0)),          # w2
                pl.BlockSpec((C, 1), lambda b, k: (0, 0)),             # b2
            ],
            out_specs=pl.BlockSpec((None, C, 1), lambda b, k: (b, 0, 0)),
            scratch_shapes=[pltpu.VMEM((C, 1), jnp.float32)],
        ),
        compiler_params=pltpu.CompilerParams(
            dimension_semantics=("parallel", "arbitrary"),
            vmem_limit_bytes=_vmem_budget_bytes()),
    )(x_flat, w1t, b1r, w2, b2c)


# Pass 2: lane-dense streaming rescale over the flattened (B*C, HW) view.
def _ca_rescale_kernel(x_ref, s_ref, o_ref):
    x = x_ref[...]
    o_ref[...] = (x * s_ref[...].astype(x.dtype)).astype(o_ref.dtype)


def _ca_rescale(x2, s2, *, donate_x):
    BC, HW = x2.shape
    item = x2.dtype.itemsize
    budget = int(_vmem_budget_bytes() * _WORKSET_FRACTION)
    sub = _sublane_multiple(x2.dtype)

    # Lane (last-dim) tile: full HW when a single row is small, otherwise a
    # 128-multiple sized toward the per-step target.
    if HW * item <= TARGET_STEP_BYTES:
        thw = HW
    else:
        thw = max(128, min(HW // 128 * 128,
                           (TARGET_STEP_BYTES // item) // 128 * 128))
    # Row tile: fill toward ~TARGET_STEP_BYTES per step within the 2x-in +
    # 2x-out double-buffer budget; round to the dtype's packed sublane multiple.
    row_bytes = thw * item
    tr_target = max(sub, TARGET_STEP_BYTES // row_bytes)
    tr_fit = max(sub, budget // (4 * row_bytes))
    tr = min(BC, tr_target, tr_fit)
    if tr < BC:
        tr = max(sub, tr // sub * sub)
    grid = (pl.cdiv(BC, tr), pl.cdiv(HW, thw))

    return pl.pallas_call(
        _ca_rescale_kernel,
        out_shape=jax.ShapeDtypeStruct((BC, HW), x2.dtype),
        grid_spec=pltpu.PrefetchScalarGridSpec(
            num_scalar_prefetch=0,
            grid=grid,
            in_specs=[
                pl.BlockSpec((tr, thw), lambda r, k: (r, k)),   # x
                pl.BlockSpec((tr, 1), lambda r, k: (r, 0)),     # scales
            ],
            out_specs=pl.BlockSpec((tr, thw), lambda r, k: (r, k)),
        ),
        compiler_params=pltpu.CompilerParams(
            dimension_semantics=("parallel", "parallel"),
            vmem_limit_bytes=_vmem_budget_bytes()),
        input_output_aliases=({0: 0} if donate_x else {}),
    )(x2, s2)


# ----------------------------------------------------------------------------
# Public wrapper
# ----------------------------------------------------------------------------
def ca_layer(x, w1, b1, w2, b2, *, donate_x=False, force_two_pass=False):
    """CALayer forward. x: (B, C, H, W). w1: (Cmid, C), b1: (Cmid,),
    w2: (C, Cmid), b2: (C,). Returns (B, C, H, W) with x's dtype."""
    B, C, H, W = x.shape
    HW = H * W
    Cmid = w1.shape[0]

    x_flat = x.reshape(B, C, HW)
    w1t = jnp.asarray(w1, jnp.float32).T               # (C, Cmid)
    b1r = jnp.asarray(b1, jnp.float32).reshape(1, Cmid)
    w2f = jnp.asarray(w2, jnp.float32)                  # (C, Cmid)
    b2c = jnp.asarray(b2, jnp.float32).reshape(C, 1)

    item = x.dtype.itemsize
    budget = int(_vmem_budget_bytes() * _WORKSET_FRACTION)
    # One batch element, double-buffered in + out, plus the small f32 MLP temps.
    fused_fits = (4 * C * HW * item + 4 * C * (Cmid + 2)) <= budget

    if fused_fits and not force_two_pass:
        out = _ca_fused(x_flat, w1t, b1r, w2f, b2c, donate_x=donate_x)
    else:
        scales = _ca_scales(x_flat, w1t, b1r, w2f, b2c)          # (B, C, 1) f32
        out = _ca_rescale(x_flat.reshape(B * C, HW),
                          scales.reshape(B * C, 1),
                          donate_x=donate_x).reshape(B, C, HW)
    return out.reshape(B, C, H, W)


def ca_layer_ref(x, w1, b1, w2, b2):
    """Pure-JAX reference matching the PyTorch CALayer forward."""
    y = jnp.mean(x, axis=(2, 3), keepdims=True)
    y = jnp.einsum("oc,bcij->boij", w1, y) + b1[None, :, None, None]
    y = jnp.maximum(y, 0.0)
    y = jnp.einsum("oc,bcij->boij", w2, y) + b2[None, :, None, None]
    y = jax.nn.sigmoid(y)
    return x * y


if __name__ == "__main__":
    B, C, H, W = 2, 32, 16, 16
    reduction = 16
    Cmid = C // reduction  # 2

    key = jax.random.PRNGKey(0)
    kx, k1, k2, k3, k4 = jax.random.split(key, 5)

    x = jax.random.normal(kx, (B, C, H, W), dtype=jnp.float32)
    w1 = 0.1 * jax.random.normal(k1, (Cmid, C), dtype=jnp.float32)   # conv1 weight
    b1 = 0.1 * jax.random.normal(k2, (Cmid,), dtype=jnp.float32)     # conv1 bias
    w2 = 0.1 * jax.random.normal(k3, (C, Cmid), dtype=jnp.float32)   # conv2 weight
    b2 = 0.1 * jax.random.normal(k4, (C,), dtype=jnp.float32)        # conv2 bias

    ref = jax.block_until_ready(ca_layer_ref(x, w1, b1, w2, b2))

    # Fused fast path (selected automatically at this size).
    out_fused = jax.block_until_ready(ca_layer(x, w1, b1, w2, b2))
    assert out_fused.shape == (B, C, H, W)
    assert jnp.allclose(out_fused, ref, atol=1e-5, rtol=1e-5), "fused path mismatch"

    # Tiled two-pass path (used automatically when C*HW exceeds the VMEM budget).
    out_tiled = jax.block_until_ready(
        ca_layer(x, w1, b1, w2, b2, force_two_pass=True))
    assert jnp.allclose(out_tiled, ref, atol=1e-5, rtol=1e-5), "two-pass path mismatch"

    print("KERNEL_OK")
</pallas_src>

<mosaic_0001>
module attributes {stable_mosaic.version = 11 : i64} {
  func.func @_ca_fused_kernel(%arg0: i32, %arg1: memref<1x32x256xf32, #tpu.memory_space<vmem>>, %arg2: memref<32x2xf32, #tpu.memory_space<vmem>>, %arg3: memref<1x2xf32, #tpu.memory_space<vmem>>, %arg4: memref<32x2xf32, #tpu.memory_space<vmem>>, %arg5: memref<32x1xf32, #tpu.memory_space<vmem>>, %arg6: memref<1x32x256xf32, #tpu.memory_space<vmem>>) attributes {dimension_semantics = [#tpu.dimension_semantics<parallel>], iteration_bounds = array<i64: 2>, scalar_prefetch = 0 : i64, scratch_operands = 0 : i64, tpu.core_type = #tpu.core_type<tc>, window_params = [{transform_indices = @transform_0, window_bounds = array<i64: 1, 32, 256>}, {pipeline_mode = #tpu.pipeline_mode<synchronous>, transform_indices = @transform_1, window_bounds = array<i64: 32, 2>}, {pipeline_mode = #tpu.pipeline_mode<synchronous>, transform_indices = @transform_2, window_bounds = array<i64: 1, 2>}, {pipeline_mode = #tpu.pipeline_mode<synchronous>, transform_indices = @transform_3, window_bounds = array<i64: 32, 2>}, {pipeline_mode = #tpu.pipeline_mode<synchronous>, transform_indices = @transform_4, window_bounds = array<i64: 32, 1>}, {transform_indices = @transform_5, window_bounds = array<i64: 1, 32, 256>}]} {
    %c0 = arith.constant 0 : index
    %c0_0 = arith.constant 0 : index
    %c0_1 = arith.constant 0 : index
    %0 = vector.load %arg1[%c0, %c0_0, %c0_1] : memref<1x32x256xf32, #tpu.memory_space<vmem>>, vector<1x32x256xf32>
    %cst = arith.constant dense<0.000000e+00> : vector<1x32xf32>
    %1 = vector.multi_reduction <add>, %0, %cst [2] : vector<1x32x256xf32> to vector<1x32xf32>
    %2 = vector.shape_cast %1 : vector<1x32xf32> to vector<1x32x1xf32>
    %cst_2 = arith.constant 3.906250e-03 : f32
    %3 = vector.broadcast %cst_2 : f32 to vector<1x32x1xf32>
    %4 = arith.mulf %2, %3 : vector<1x32x1xf32>
    %c0_3 = arith.constant 0 : index
    %c0_4 = arith.constant 0 : index
    %5 = vector.load %arg2[%c0_3, %c0_4] : memref<32x2xf32, #tpu.memory_space<vmem>>, vector<32x2xf32>
    %6 = vector.shape_cast %5 : vector<32x2xf32> to vector<1x32x2xf32>
    %7 = vector.broadcast %4 : vector<1x32x1xf32> to vector<1x32x2xf32>
    %8 = arith.mulf %6, %7 : vector<1x32x2xf32>
    %cst_5 = arith.constant dense<0.000000e+00> : vector<1x2xf32>
    %9 = vector.multi_reduction <add>, %8, %cst_5 [1] : vector<1x32x2xf32> to vector<1x2xf32>
    %10 = vector.shape_cast %9 : vector<1x2xf32> to vector<1x1x2xf32>
    %c0_6 = arith.constant 0 : index
    %c0_7 = arith.constant 0 : index
    %11 = vector.load %arg3[%c0_6, %c0_7] : memref<1x2xf32, #tpu.memory_space<vmem>>, vector<1x2xf32>
    %12 = vector.shape_cast %11 : vector<1x2xf32> to vector<1x1x2xf32>
    %13 = arith.addf %10, %12 : vector<1x1x2xf32>
    %cst_8 = arith.constant 0.000000e+00 : f32
    %14 = vector.broadcast %cst_8 : f32 to vector<1x1x2xf32>
    %15 = arith.maximumf %13, %14 : vector<1x1x2xf32>
    %c0_9 = arith.constant 0 : index
    %c0_10 = arith.constant 0 : index
    %16 = vector.load %arg4[%c0_9, %c0_10] : memref<32x2xf32, #tpu.memory_space<vmem>>, vector<32x2xf32>
    %17 = vector.shape_cast %16 : vector<32x2xf32> to vector<1x32x2xf32>
    %18 = vector.broadcast %15 : vector<1x1x2xf32> to vector<1x32x2xf32>
    %19 = arith.mulf %17, %18 : vector<1x32x2xf32>
    %cst_11 = arith.constant dense<0.000000e+00> : vector<1x32xf32>
    %20 = vector.multi_reduction <add>, %19, %cst_11 [2] : vector<1x32x2xf32> to vector<1x32xf32>
    %21 = vector.shape_cast %20 : vector<1x32xf32> to vector<1x32x1xf32>
    %c0_12 = arith.constant 0 : index
    %c0_13 = arith.constant 0 : index
    %22 = vector.load %arg5[%c0_12, %c0_13] : memref<32x1xf32, #tpu.memory_space<vmem>>, vector<32x1xf32>
    %23 = vector.shape_cast %22 : vector<32x1xf32> to vector<1x32x1xf32>
    %24 = arith.addf %21, %23 : vector<1x32x1xf32>
    %25 = arith.negf %24 : vector<1x32x1xf32>
    %26 = math.exp %25 : vector<1x32x1xf32>
    %cst_14 = arith.constant 1.000000e+00 : f32
    %27 = vector.broadcast %cst_14 : f32 to vector<1x32x1xf32>
    %28 = arith.addf %27, %26 : vector<1x32x1xf32>
    %29 = arith.divf %27, %28 : vector<1x32x1xf32>
    %30 = vector.broadcast %29 : vector<1x32x1xf32> to vector<1x32x256xf32>
    %31 = arith.mulf %0, %30 : vector<1x32x256xf32>
    %c0_15 = arith.constant 0 : index
    %c0_16 = arith.constant 0 : index
    %c0_17 = arith.constant 0 : index
    %32 = vector.load %arg6[%c0_15, %c0_16, %c0_17] : memref<1x32x256xf32, #tpu.memory_space<vmem>>, vector<1x32x256xf32>
    tpu.vector_store %arg6[%c0_15, %c0_16, %c0_17], %31 {strides = array<i32>} : memref<1x32x256xf32, #tpu.memory_space<vmem>>, vector<1x32x256xf32>,
    return
  }
  func.func @transform_0(%arg0: i32) -> (i32, i32, i32) {
    %c0_i32 = arith.constant 0 : i32
    %c0_i32_0 = arith.constant 0 : i32
    %c0_i32_1 = arith.constant 0 : i32
    return %arg0, %c0_i32, %c0_i32_0 : i32, i32, i32
  }
  func.func @transform_1(%arg0: i32) -> (i32, i32) {
    %c0_i32 = arith.constant 0 : i32
    %c0_i32_0 = arith.constant 0 : i32
    %c0_i32_1 = arith.constant 0 : i32
    return %c0_i32, %c0_i32_0 : i32, i32
  }
  func.func @transform_2(%arg0: i32) -> (i32, i32) {
    %c0_i32 = arith.constant 0 : i32
    %c0_i32_0 = arith.constant 0 : i32
    %c0_i32_1 = arith.constant 0 : i32
    return %c0_i32, %c0_i32_0 : i32, i32
  }
  func.func @transform_3(%arg0: i32) -> (i32, i32) {
    %c0_i32 = arith.constant 0 : i32
    %c0_i32_0 = arith.constant 0 : i32
    %c0_i32_1 = arith.constant 0 : i32
    return %c0_i32, %c0_i32_0 : i32, i32
  }
  func.func @transform_4(%arg0: i32) -> (i32, i32) {
    %c0_i32 = arith.constant 0 : i32
    %c0_i32_0 = arith.constant 0 : i32
    %c0_i32_1 = arith.constant 0 : i32
    return %c0_i32, %c0_i32_0 : i32, i32
  }
  func.func @transform_5(%arg0: i32) -> (i32, i32, i32) {
    %c0_i32 = arith.constant 0 : i32
    %c0_i32_0 = arith.constant 0 : i32
    %c0_i32_1 = arith.constant 0 : i32
    return %arg0, %c0_i32, %c0_i32_0 : i32, i32, i32
  }
}

</mosaic_0001>

<bundles_post_ra>
// kernel: tpu_custom_call.1
= control target key start
LH: loop header
LB: loop body
LE: loop exit
PB: predicated region body
PF: predicated region fallthrough
CT: control target
= control target key end

     0   :  { %10 = vsyncpa [#allocation3], 0  ;;  %s928_s0 = inlined_call_operand.hbm [shape: f32[2,32,256], index: 0, kind: input, shape index: {}]   ;;  %s929_s1 = inlined_call_operand.vmem [shape: f32[32,2], index: 1, kind: input, shape index: {}]   ;;  %s930_s2 = inlined_call_operand.vmem [shape: f32[1,2], index: 2, kind: input, shape index: {}]   ;;  %s931_s3 = inlined_call_operand.vmem [shape: f32[32,2], index: 3, kind: input, shape index: {}]   ;;  %s932_s4 = inlined_call_operand.vmem [shape: f32[32,1], index: 4, kind: input, shape index: {}]   ;;  %s933_s5 = inlined_call_operand.hbm [shape: f32[2,32,256], index: 5, kind: output, shape index: {}]  }
   0x1   :  { %12 = vsyncpa [#allocation3 + $0x1], 0 }
   0x2   :  { %13 = vsyncpa [#allocation4], 0 }
   0x3   :  { %15 = vsyncpa [#allocation4 + $0x1], 0  ;;  %s691_s18 = smov 0   ;;  %s693_s19 = smov 0  }
   0x4   :  { %s695_s20 = smov 0   ;;  %s697_s21 = smov 0  }
   0x5 LB: > { %s712_s22 = sadd.s32 4294967295, %s652_s21   ;;  %s471_s23 = sadd.s32 4294967294, %s652_s21   ;;  %s652_s21 = sphi %s697_s21, %s948_s21   ;;  %s648_s20 = sphi %s695_s20, %s947_s20   ;;  %s644_s19 = sphi %s693_s19, %s946_s19   ;;  %s640_s18 = sphi %s691_s18, %s945_s18  }
   0x6   : > { %s716_s24 = sadd.s32 1, %s652_s21   ;;  %s28_s25 = sadd.s32 1, %s648_s20 }
   0x7   : > { %s25_s26 = ssub.s32 %s652_s21, %s716_s24  ;;  %p35_p0 = scmp.ne.s32.totalorder %s648_s20, %s644_s19 }
   0x8   : > { %p26_p1 = scmp.eq.s32.totalorder %s25_s26, 0  ;;  %p36_p2 = scmp.eq.s32.totalorder %s652_s21, 0 }
   0x9   : > { %p41_p3 = scmp.ne.s32.totalorder %s644_s19, %s640_s18  ;;  %p42_p4 = scmp.eq.s32.totalorder %s712_s22, 0 }
   0xa   : > { %s728_s27 = scalar_select %p26_p1, %s648_s20, %s28_s25  }
   0xb   : > { %p730_p5 = por %p36_p2, %p35_p0  ;;  %p734_p6 = por %p42_p4, %p41_p3 }
   0xc   : > { %p149_p7 = scmp.eq.s32.totalorder %s712_s22, 1  ;;  %p155_p8 = scmp.eq.s32.totalorder %s471_s23, 1 }
   0xd   : > { %s937_s29 = scalar_select %p734_p6, 1, 0 }
   0xe   : > { %p503_p10 = scmp.lt.s32.totalorder %s652_s21, 2  ;;  %p741_p11 = por %p149_p7, %p35_p0 }
   0xf   : > { %p745_p12 = por %p155_p8, %p41_p3  ;;  %s187_s7 = sand.u32 1, %s648_s20  }
  0x10   : > { %s938_s30 = scalar_select %p741_p11, 1, 0 }
  0x11   : > { %s939_s6 = scalar_select %p745_p12, 1, 0 }
  0x12   : > { %s489_s8 = sshll.u32 %s652_s21, 10  ;;  %s474_s9 = sshll.u32 %s187_s7, 6 }
  0x13   : > { %s754_s12 = scalar_lea.hbm %s928_s0, %s489_s8  ;;  %s191_s13 = scalar_lea.vmem [#allocation2], %s474_s9 }
  0x14   : > { %s198_s14 = sshll.u32 %s191_s13, 4  ;;  %p758_p13 = pnand %p503_p10, %p730_p5  ;;  %s762_s14 = int_to_ptr.vmem [resolvable:$true] %s198_s14 }
  0x15   : > { %s764_s16 = scalar_lea.sflag [#allocation3], %s187_s7  ;;  %s560_s17 = scalar_lea.hbm %s754_s12, 1024 }
  0x16   : > { %p561_p0 = scmp.ne.s32.totalorder %s754_s12, %s560_s17  ;;  %p562_p1 = pneg %p758_p13 }
  0x17   : > { %s565_s26 = scalar_lea.hbm %s928_s0, 2048  ;;  %p566_p4 = scmp.lt.s32.totalorder %s754_s12, %s928_s0 }
  0x18   : > { %p563_p2 = pnand %p562_p1, %p561_p0  ;;  %p567_p5 = scmp.lt.s32.totalorder %s565_s26, %s560_s17 }
  0x1a   : > { %p564_p3 = pneg %p563_p2  ;;  %p568_p7 = por %p567_p5, %p566_p4 }
  0x1c   : > { %p569_p8 = pnand %p568_p7, %p564_p3 }
  0x1e   : > { %572 = shalt.err (!%p569_p8)
}
  0x1f   : > { %s573_s7 = scalar_lea.vmem %s762_s14, 1024  ;;  %s654_s9 = smov [#allocation2]  }
  0x20   : > { %p574_p10 = scmp.ne.s32.totalorder %s762_s14, %s573_s7  ;;  %s578_s10 = sshll.u32 %s654_s9, 4  ;;  %s579_s10 = int_to_ptr.vmem [resolvable:$false] %s578_s10 }
  0x21   : > { %s580_s11 = scalar_lea.vmem %s579_s10, 2048  ;;  %p581_p2 = scmp.lt.s32.totalorder %s762_s14, %s579_s10 }
  0x22   : > { %p576_p9 = pnand %p574_p10, %p562_p1  ;;  %p582_p12 = scmp.lt.s32.totalorder %s580_s11, %s573_s7 }
  0x24   : > { %p577_p0 = pneg %p576_p9  ;;  %p583_p11 = por %p582_p12, %p581_p2 }
  0x26   : > { %p584_p6 = pnand %p583_p11, %p577_p0 }
  0x28   : > { %587 = shalt.err (!%p584_p6)
}
  0x29   : > { %s655_s13 = smov 256   ;;  %s656_s17 = smov 16  }
  0x2a   : > { %498 = dma.hbm_to_vmem [thread:$0]  (!%p758_p13), %s754_s12, 1024, %s762_s14, %s764_s16, %s655_s13, %s655_s13, %s656_s17  }
  0x2b   : > { %p477_p9 = scmp.ge.s32.totalorder %s652_s21, 1  ;;  %p206_p1 = scmp.lt.s32.totalorder %s652_s21, 3 }
  0x2d   : > { %p207_p3 = pnand %p477_p9, %p206_p1 }
  0x2e   : > { %s788_s23 = sand.u32 (!%p207_p3), 1, %s644_s19   ;;  %p941_p6 = scmp.ne.s32.totalorder (!%p207_p3), %s937_s29, 0 }
  0x2f   : > { %210 = sbr.rel (%p207_p3) target bundleno = 551 (0x227), region = 40  ;;  %s478_s25 = sshll.u32 (!%p207_p3), %s788_s23, 6 }
  0x30   : > { %s213_s26 = scalar_lea.sflag (!%p207_p3), [#allocation3], %s788_s23  ;;  %s216_s28 = scalar_lea.vmem (!%p207_p3), [#allocation2], %s478_s25 }
  0x34   : > { %631 = dma.done.wait (%p941_p6), %s213_s26, 1024  }
  0x35   : > { %633 = vsyncadd (%p941_p6), %s213_s26, 4294966272  ;;  %v798_v0 = vld [vmem:[%s216_s28] sm:$0xff]  ;;  %v800_v1 = vld [vmem:[%s216_s28 + $0x8] sm:$0xff]  ;;  %vm275_vm0 = vcmask 15360   ;;  %v296_v38 = vlaneseq  ;;  %v657_v60 = vmov 0   ;;  %s242_s26 = scalar_lea.vmem [#allocation5], %s478_s25 }
  0x36   : > { %v802_v2 = vld [vmem:[%s216_s28 + $0x20] sm:$0xff]  ;;  %v251_v3 = vadd.f32 %v800_v1, %v798_v0  ;;  %v806_v4 = vld [vmem:[%s216_s28 + $0x28] sm:$0xff]  ;;  %v808_v5 = vld [vmem:[%s216_s28 + $0x10] sm:$0xff]  ;;  %543 = vset.pattern.permute.xlu1 %v657_v60  ;;  %542 = vset.pattern.permute.xlu0 %v657_v60  ;;  %s490_s29 = sshll.u32 %s712_s22, 10  ;;  %s385_s22 = scalar_lea.sflag [#allocation4], %s788_s23 }
  0x37   : > { %v810_v6 = vld [vmem:[%s216_s28 + $0x18] sm:$0xff]  ;;  %v257_v7 = vadd.f32 %v806_v4, %v802_v2  ;;  %v814_v8 = vld [vmem:[%s216_s28 + $0x30] sm:$0xff]  ;;  %v267_v15 = vld [vmem:[%s929_s1] sm:$0xff]  ;;  %v297_v41 = vshrl.u32 %v296_v38, 7  ;;  %s883_s14 = scalar_lea.hbm %s933_s5, %s490_s29  ;;  %p942_p12 = scmp.ne.s32.totalorder %s938_s30, 0 }
  0x38   : > { %v816_v9 = vld [vmem:[%s216_s28 + $0x38] sm:$0xff]  ;;  %252 = vadd.xlane.f32.xlu0 %v251_v3  ;;  %v254_v10 = vadd.f32 %v810_v6, %v808_v5  ;;  %v269_v17 = vld [vmem:[%s929_s1 + $0x10] sm:$0xff]  ;;  %v268_v18 = vld [vmem:[%s929_s1 + $0x8] sm:$0xff]  ;;  %s398_s28 = sshll.u32 %s242_s26, 4  ;;  %s658_s16 = smov [#allocation5]   ;;  %s878_s28 = int_to_ptr.vmem [resolvable:$true] %s398_s28 }
  0x39   : > { %258 = vadd.xlane.f32.xlu1 %v257_v7  ;;  %v260_v11 = vadd.f32 %v816_v9, %v814_v8  ;;  %v270_v22 = vld [vmem:[%s929_s1 + $0x18] sm:$0xff]  ;;  %v289_v42 = vld [vmem:[%s930_s2] sm:$0x1]  ;;  %v298_v45 = vsub.s32 0, %v297_v41  ;;  %v293_v47 = vld [vmem:[%s931_s3 + $0x8] sm:$0xff]  ;;  %s588_s15 = scalar_lea.vmem %s878_s28, 1024 }
  0x3a   : > { %v292_v48 = vld [vmem:[%s931_s3] sm:$0xff]  ;;  %v295_v50 = vld [vmem:[%s931_s3 + $0x18] sm:$0xff]  ;;  %v294_v51 = vld [vmem:[%s931_s3 + $0x10] sm:$0xff]  ;;  %p589_p11 = scmp.ne.s32.totalorder %s878_s28, %s588_s15  ;;  %s592_s8 = sshll.u32 %s658_s16, 4  ;;  %s593_s8 = int_to_ptr.vmem [resolvable:$false] %s592_s8 }
  0x3b   : > { %v317_v61 = vld [vmem:[%s932_s4 + $0x8] sm:$0xff]  ;;  %v316_v62 = vld [vmem:[%s932_s4] sm:$0xff]  ;;  %s594_s7 = scalar_lea.vmem %s593_s8, 2048  ;;  %p595_p5 = scmp.lt.s32.totalorder %s878_s28, %s593_s8 }
  0x3c   : > { %255 = vadd.xlane.f32.xlu0 %v254_v10  ;;  %p590_p13 = pnand %p589_p11, %p942_p12  ;;  %p596_p7 = scmp.lt.s32.totalorder %s594_s7, %s588_s15 }
  0x3d   : > { %261 = vadd.xlane.f32.xlu1 %v260_v11  ;;  %v319_v11 = vld [vmem:[%s932_s4 + $0x18] sm:$0xff] }
  0x3e   : > { %p591_p4 = pneg %p590_p13  ;;  %p597_p8 = por %p596_p7, %p595_p5 }
  0x40   : > { %p598_p10 = pnand %p597_p8, %p591_p4 }
  0xc1   : > { %v253_v12 = vpop.xlane.xlu0 %252 }
  0xc2   : > { %v263_v13 = vmul.f32 0.00390625, %v253_v12  ;;  %v259_v14 = vpop.xlane.xlu1 %258  ;;  %v318_v12 = vld [vmem:[%s932_s4 + $0x10] sm:$0xff] }
  0xc3   : > { %v265_v16 = vmul.f32 0.00390625, %v259_v14 }
  0xc4   : > { %v271_v20 = vmul.f32 %v267_v15, %v263_v13 }
  0xc5   : > { %v256_v19 = vpop.xlane.xlu0 %255  ;;  %v273_v25 = vmul.f32 %v269_v17, %v265_v16 }
  0xc6   : > { %v264_v21 = vmul.f32 0.00390625, %v256_v19  ;;  %v262_v23 = vpop.xlane.xlu1 %261  ;;  %v276_v28 = vsel %vm275_vm0, %v271_v20, 0.0 }
  0xc7   : > { %v266_v24 = vmul.f32 0.00390625, %v262_v23  ;;  %v279_v31 = vsel %vm275_vm0, %v273_v25, 0.0 }
  0xc8   : > { %v272_v26 = vmul.f32 %v268_v18, %v264_v21 }
  0xc9   : > { %v274_v27 = vmul.f32 %v270_v22, %v266_v24 }
  0xca   : > { %v277_v29 = vsel %vm275_vm0, %v272_v26, 0.0 }
  0xcb   : > { %v278_v30 = vadd.f32 %v277_v29, %v276_v28  ;;  %v281_v32 = vsel %vm275_vm0, %v274_v27, 0.0 }
  0xcd   : > { %v280_v33 = vadd.f32 %v279_v31, %v278_v30 }
  0xcf   : > { %v282_v34 = vadd.f32 %v281_v32, %v280_v33 }
  0xd1   : > { %v283_v35 = vrot.slane %v282_v34, 4 }
  0xd3   : > { %v284_v36 = vadd.f32 %v283_v35, %v282_v34 }
  0xd5   : > { %v285_v37 = vrot.slane %v284_v36, 2 }
  0xd7   : > { %v286_v39 = vadd.f32 %v285_v37, %v284_v36 }
  0xd9   : > { %v287_v40 = vrot.slane %v286_v39, 1 }
  0xdb   : > { %v288_v43 = vadd.f32 %v287_v40, %v286_v39 }
  0xdd   : > { %v290_v44 = vadd.f32 %v289_v42, %v288_v43 }
  0xdf   : > { %v291_v46 = vmax.f32 %v290_v44, 0.0 }
  0xe1   : > { %v299_v49 = vrot.slane %v291_v46, %v298_v45 }
  0xe3   : > { %v301_v52 = vmul.f32 %v299_v49, %v293_v47  ;;  %v300_v53 = vmul.f32 %v299_v49, %v292_v48  ;;  %v303_v56 = vmul.f32 %v299_v49, %v295_v50  ;;  %v302_v57 = vmul.f32 %v299_v49, %v294_v51 }
  0xe5   : > { %v307_v54 = vsel %vm275_vm0, %v301_v52, 0.0  ;;  %v304_v55 = vsel %vm275_vm0, %v300_v53, 0.0  ;;  %v313_v58 = vsel %vm275_vm0, %v303_v56, 0.0  ;;  %v310_v59 = vsel %vm275_vm0, %v302_v57, 0.0 }
  0xe6   : > { %308 = vadd.xlane.f32.xlu1 %v307_v54  ;;  %305 = vadd.xlane.f32.xlu0 %v304_v55 }
  0xea   : > { %314 = vadd.xlane.f32.xlu1 %v313_v58  ;;  %311 = vadd.xlane.f32.xlu0 %v310_v59 }
 0x16f   : > { %v309_v63 = vpop.xlane.xlu1 %308  ;;  %v306_v3 = vpop.xlane.xlu0 %305 }
 0x170   : > { %v321_v7 = vadd.f32 %v317_v61, %v309_v63  ;;  %v320_v10 = vadd.f32 %v316_v62, %v306_v3 }
 0x172   : > { %v481_v13 = vmul.f32 -1.442695, %v321_v7  ;;  %v480_v14 = vmul.f32 -1.442695, %v320_v10 }
 0x173   : > { %v315_v15 = vpop.xlane.xlu1 %314  ;;  %v312_v16 = vpop.xlane.xlu0 %311 }
 0x174   : > { %544 = vpow2.f32 %v481_v13  ;;  %v323_v17 = vadd.f32 %v319_v11, %v315_v15  ;;  %v322_v18 = vadd.f32 %v318_v12, %v312_v16 }
 0x175   : > { %546 = vpow2.f32 %v480_v14 }
 0x176   : > { %v483_v19 = vmul.f32 -1.442695, %v323_v17  ;;  %v482_v20 = vmul.f32 -1.442695, %v322_v18 }
 0x178   : > { %548 = vpow2.f32 %v483_v19 }
 0x179   : > { %550 = vpow2.f32 %v482_v20 }
 0x181   : > { %v545_v21 = vpop.eup %544 }
 0x182   : > { %v547_v22 = vpop.eup %546  ;;  %v337_v23 = vadd.f32 1.0, %v545_v21 }
 0x183   : > { %v336_v24 = vadd.f32 1.0, %v547_v22 }
 0x184   : > { %552 = vrcp.f32 %v337_v23 }
 0x185   : > { %v549_v25 = vpop.eup %548  ;;  %554 = vrcp.f32 %v336_v24 }
 0x186   : > { %v551_v26 = vpop.eup %550  ;;  %v339_v28 = vadd.f32 1.0, %v549_v25 }
 0x187   : > { %v338_v27 = vadd.f32 1.0, %v551_v26 }
 0x189   : > { %556 = vrcp.f32 %v338_v27 }
 0x18a   : > { %558 = vrcp.f32 %v339_v28 }
 0x191   : > { %v553_v29 = vpop.eup %552 }
 0x192   : > { %v555_v30 = vpop.eup %554  ;;  %355 = vperm.xlu1 %543, %v553_v29  }
 0x193   : > { %350 = vperm.xlu0 %542, %v555_v30  }
 0x196   : > { %v557_v31 = vpop.eup %556 }
 0x197   : > { %360 = vperm.xlu1 %543, %v557_v31   ;;  %v559_v32 = vpop.eup %558 }
 0x19b   : > { %365 = vperm.xlu1 %543, %v559_v32  }
 0x20d   : > { %v356_v33 = vpop.permute.xlu1 %355 }
 0x20e   : > { %v370_v34 = vmul.f32 %v356_v33, %v808_v5  ;;  %v371_v35 = vmul.f32 %v356_v33, %v810_v6  ;;  %v351_v36 = vpop.permute.xlu0 %350 }
 0x20f   : > { %v368_v37 = vmul.f32 %v351_v36, %v798_v0  ;;  %v369_v38 = vmul.f32 %v351_v36, %v800_v1 }
 0x210   : > { %378 = vst [vmem:[%s242_s26 + $0x10] sm:$0xff] %v370_v34  ;;  %379 = vst [vmem:[%s242_s26 + $0x18] sm:$0xff] %v371_v35 }
 0x211   : > { %376 = vst [vmem:[%s242_s26] sm:$0xff] %v368_v37  ;;  %377 = vst [vmem:[%s242_s26 + $0x8] sm:$0xff] %v369_v38 }
 0x212   : > { %v361_v39 = vpop.permute.xlu1 %360 }
 0x213   : > { %v372_v40 = vmul.f32 %v361_v39, %v802_v2  ;;  %v373_v5 = vmul.f32 %v361_v39, %v806_v4 }
 0x215   : > { %380 = vst [vmem:[%s242_s26 + $0x20] sm:$0xff] %v372_v40  ;;  %381 = vst [vmem:[%s242_s26 + $0x28] sm:$0xff] %v373_v5 }
 0x216   : > { %v366_v0 = vpop.permute.xlu1 %365 }
 0x217   : > { %v374_v1 = vmul.f32 %v366_v0, %v814_v8  ;;  %v375_v2 = vmul.f32 %v366_v0, %v816_v9 }
 0x219   : > { %382 = vst [vmem:[%s242_s26 + $0x30] sm:$0xff] %v374_v1  ;;  %383 = vst [vmem:[%s242_s26 + $0x38] sm:$0xff] %v375_v2 }
 0x21a   : > { %601 = shalt.err (!%p598_p10)
}
 0x21b   : > { %s602_s9 = scalar_lea.hbm %s883_s14, 1024  ;;  %s606_s13 = scalar_lea.hbm %s933_s5, 2048 }
 0x21c   : > { %p603_p0 = scmp.ne.s32.totalorder %s883_s14, %s602_s9  ;;  %p607_p1 = scmp.lt.s32.totalorder %s883_s14, %s933_s5 }
 0x21d   : > { %p608_p3 = scmp.lt.s32.totalorder %s606_s13, %s602_s9 }
 0x21e   : > { %p604_p2 = pnand %p603_p0, %p942_p12 }
 0x21f   : > { %p609_p6 = por %p608_p3, %p607_p1 }
 0x220   : > { %p605_p9 = pneg %p604_p2 }
 0x222   : > { %p610_p11 = pnand %p609_p6, %p605_p9 }
 0x224   : > { %613 = shalt.err (!%p610_p11)
}
 0x225   : > { %s659_s29 = smov 256   ;;  %s660_s25 = smov 16  }
 0x226   : > { %493 = dma.vmem_to_hbm [thread:$0]  (%p942_p12), %s878_s28, 1024, %s883_s14, %s385_s22, %s659_s29, %s659_s29, %s660_s25  }
 0x227 PF: > { %s413_s12 = sand.u32 1, %s640_s18   ;;  %p943_p13 = scmp.ne.s32.totalorder %s939_s6, 0 }
 0x228   : > { %p944_p4 = scmp.ge.s32.totalorder %s652_s21, 2  ;;  %s414_s15 = scalar_lea.sflag [#allocation4], %s413_s12 }
 0x22a   : > { %p500_p5 = pnand %p944_p4, %p943_p13 }
 0x22c   : > { %p501_p7 = pneg %p500_p5 }
 0x22e   : > { %635 = dma.done.wait (%p501_p7), %s414_s15, 1024  }
 0x22f   : > { %637 = vsyncadd (%p501_p7), %s414_s15, 4294966272  ;;  %p18_p8 = scmp.ge.s32.totalorder %s716_s24, 4   ;;  %s945_s18 = smov %s644_s19 }
 0x230   : > { %s946_s19 = smov %s648_s20  ;;  %s947_s20 = smov %s728_s27 }
 0x231   : > { %s948_s21 = smov %s716_s24  ;;  %20 = sbr.rel (!%p18_p8) target bundleno = 5 (0x5), region = 85 }
 0x236   :  { %419 = vsyncpa [#allocation3], 1 }
 0x237   :  { %421 = vsyncpa [#allocation3 + $0x1], 1 }
 0x238   :  { %422 = vsyncpa [#allocation4], 1 }
 0x239   :  { %424 = vsyncpa [#allocation4 + $0x1], 1 }

</bundles_post_ra>
